<compile_context>
chip_gen: v6e
topology: v6e:2x2x1
jax: 0.10.0
libtpu: 0.0.40
codegen_flags: <defaults>
</compile_context>

<pallas_src>
import functools

import jax
import jax.numpy as jnp
from jax.experimental import pallas as pl
from jax.experimental.pallas import tpu as pltpu

IN = 2                 # input / output features
HID = 50               # hidden width
HID_PAD = 56           # hidden padded to a multiple of 8 (sublane tile)
P_ROWS = 64            # 56 rows of layer-1 params + 8 rows of layer-2 params
LANE = 128
MAX_TILE_DEFAULT = 4096
MIN_PARALLEL_STEPS = 2  # keep v7x's 2 TensorCores busy; ~neutral on v5e/v6e


def _round_up(x, m):
    return ((x + m - 1) // m) * m


def _choose_tile(batch, max_tile):
    """Lane tile: multiple of 128, <= max_tile, and (for large batches) small
    enough that the 'parallel' grid has >= MIN_PARALLEL_STEPS steps."""
    max_tile = max(LANE, (int(max_tile) // LANE) * LANE)   # enforce 128-multiple
    b_lanes = _round_up(int(batch), LANE)
    tile = min(max_tile, _round_up(pl.cdiv(b_lanes, MIN_PARALLEL_STEPS), LANE))
    return max(tile, LANE)


def odefunc_kernel(y_ref, p_ref, o_ref):
    # y_ref : [2, TB]         batch on the lane axis (lane-dense)
    # p_ref : [64, 128]       single resident parameter slab:
    #                           rows 0:50,  col 0  = W1[:, 0]
    #                           rows 0:50,  col 1  = W1[:, 1]
    #                           rows 0:50,  col 2  = b1
    #                           rows 56:58, cols 0:50 = W2
    #                           rows 56:58, col 56    = b2
    #                           (everything else is zero)
    # o_ref : [2, TB]         dy/dt, same layout as y
    y = y_ref[...]
    y3 = (y * y) * y                              # explicit cube: two VPU vmuls

    w1c0 = p_ref[:HID_PAD, 0:1]                   # [56, 1]
    w1c1 = p_ref[:HID_PAD, 1:2]
    b1 = p_ref[:HID_PAD, 2:3]

    # Layer 1: K=2 contraction as VPU broadcast-FMAs (no MXU round-trip).
    h = w1c0 * y3[0:1, :] + w1c1 * y3[1:2, :] + b1        # [56, TB]
    h = jnp.tanh(h)                                        # EUP; padded rows stay 0

    w2 = p_ref[HID_PAD:HID_PAD + IN, 0:HID_PAD]            # [2, 56] (pad cols zero)
    b2 = p_ref[HID_PAD:HID_PAD + IN, HID_PAD:HID_PAD + 1]  # [2, 1]

    # Layer 2: [2,56] x [56,TB] on the MXU, f32 accumulation, 2-row output.
    out = jnp.dot(w2, h, preferred_element_type=jnp.float32) + b2   # [2, TB]
    o_ref[...] = out.astype(o_ref.dtype)


def pack_params(w1, b1, w2, b2):
    """Pack PyTorch-layout params (W1:[50,2], b1:[50], W2:[2,50], b2:[2]) into
    a single lane-aligned (64, 128) slab. Done once at init, reused per call."""
    p = jnp.zeros((P_ROWS, LANE), jnp.float32)
    p = p.at[:HID, 0].set(w1[:, 0])
    p = p.at[:HID, 1].set(w1[:, 1])
    p = p.at[:HID, 2].set(b1)
    p = p.at[HID_PAD:HID_PAD + IN, :HID].set(w2)
    p = p.at[HID_PAD:HID_PAD + IN, HID_PAD].set(b2)
    return p


def _odefunc_pallas(y_fm, params, tile):
    """y_fm: [IN, B_pad] with B_pad a multiple of `tile`. Returns [IN, B_pad]."""
    b_pad = y_fm.shape[1]
    return pl.pallas_call(
        odefunc_kernel,
        out_shape=jax.ShapeDtypeStruct((IN, b_pad), y_fm.dtype),
        grid=(b_pad // tile,),
        in_specs=[
            pl.BlockSpec((IN, tile), lambda i: (0, i)),        # batch stream
            pl.BlockSpec((P_ROWS, LANE), lambda i: (0, 0)),    # weights: VMEM-resident
        ],
        out_specs=pl.BlockSpec((IN, tile), lambda i: (0, i)),  # 2-row lane-dense output
        compiler_params=pltpu.CompilerParams(
            dimension_semantics=("parallel",)),
    )(y_fm, params)


@functools.partial(jax.jit, static_argnames=("max_tile",))
def odefunc_rhs_fm(y_fm, params, max_tile=MAX_TILE_DEFAULT):
    """Feature-major RHS: y_fm is [2, B_pad]; returns dy in the same layout.
    Keeps the ODE state batch-on-lane across the whole integrator (no
    transpose / layout plumbing per RHS evaluation)."""
    b_in = y_fm.shape[1]
    tile = _choose_tile(b_in, max_tile)
    b_full = _round_up(b_in, tile)
    if b_full != b_in:                       # static under jit
        y_fm = jnp.pad(y_fm, ((0, 0), (0, b_full - b_in)))
    out = _odefunc_pallas(y_fm, params, tile)
    if b_full != b_in:
        out = out[:, :b_in]
    return out


@functools.partial(jax.jit, static_argnames=("max_tile",))
def odefunc_forward(t, y, params, max_tile=MAX_TILE_DEFAULT):
    """PyTorch-layout forward(t, y): y is [B, 2], returns [B, 2]. `t` unused."""
    del t
    B = y.shape[0]
    tile = _choose_tile(B, max_tile)
    b_pad = _round_up(B, tile)
    y_fm = jnp.pad(y.T, ((0, 0), (0, b_pad - B)))   # single pad, batch -> lanes
    out_fm = _odefunc_pallas(y_fm, params, tile)
    return out_fm[:, :B].T


if __name__ == "__main__":
    key = jax.random.PRNGKey(0)
    kw1, kw2, kb1, kb2, ky, ky2 = jax.random.split(key, 6)

    # PyTorch-layout parameters: Linear(2,50) weight (50,2), Linear(50,2) weight (2,50)
    w1 = 0.1 * jax.random.normal(kw1, (HID, IN), dtype=jnp.float32)
    b1 = jnp.zeros((HID,), jnp.float32)            # nn.init.constant_(bias, 0)
    w2 = 0.1 * jax.random.normal(kw2, (IN, HID), dtype=jnp.float32)
    b2 = jnp.zeros((IN,), jnp.float32)

    p = pack_params(w1, b1, w2, b2)                # packed once

    def ref_fn(y, w1, b1, w2, b2):                 # PyTorch semantics: x @ W.T + b
        return jnp.tanh((y ** 3) @ w1.T + b1) @ w2.T + b2

    t = jnp.float32(0.0)                           # unused, signature parity

    # 1) small batch (PyTorch-layout wrapper)
    B = 8
    y = jax.random.normal(ky, (B, IN), dtype=jnp.float32)
    out = jax.block_until_ready(odefunc_forward(t, y, p))
    assert out.shape == (B, IN)
    assert jnp.allclose(out, ref_fn(y, w1, b1, w2, b2), atol=1e-5, rtol=1e-5)

    # 2) non-zero biases (exercise both bias paths in the packed slab)
    b1n = 0.1 * jax.random.normal(kb1, (HID,), dtype=jnp.float32)
    b2n = 0.1 * jax.random.normal(kb2, (IN,), dtype=jnp.float32)
    pn = pack_params(w1, b1n, w2, b2n)
    out2 = jax.block_until_ready(odefunc_forward(t, y, pn))
    assert jnp.allclose(out2, ref_fn(y, w1, b1n, w2, b2n), atol=1e-5, rtol=1e-5)

    # 3) multi-step grid + ragged batch (tile padding path, >=2 parallel steps)
    B2 = 300
    y2 = jax.random.normal(ky2, (B2, IN), dtype=jnp.float32)
    out3 = jax.block_until_ready(odefunc_forward(t, y2, pn, max_tile=256))
    assert jnp.allclose(out3, ref_fn(y2, w1, b1n, w2, b2n), atol=1e-5, rtol=1e-5)

    # 4) feature-major path (integrator keeps state as [2, B_pad]; no transposes)
    y_fm = jnp.pad(y.T, ((0, 0), (0, LANE - B)))   # [2, 128]
    out_fm = jax.block_until_ready(odefunc_rhs_fm(y_fm, pn))
    assert out_fm.shape == (IN, LANE)
    assert jnp.allclose(out_fm[:, :B].T, ref_fn(y, w1, b1n, w2, b2n),
                        atol=1e-5, rtol=1e-5)

    print("KERNEL_OK")
</pallas_src>

<mosaic_0001>
module attributes {stable_mosaic.version = 11 : i64} {
  func.func @odefunc_kernel(%arg0: i32, %arg1: memref<2x128xf32, #tpu.memory_space<vmem>>, %arg2: memref<64x128xf32, #tpu.memory_space<vmem>>, %arg3: memref<2x128xf32, #tpu.memory_space<vmem>>) attributes {dimension_semantics = [#tpu.dimension_semantics<parallel>], iteration_bounds = array<i64: 1>, scalar_prefetch = 0 : i64, scratch_operands = 0 : i64, tpu.core_type = #tpu.core_type<tc>, window_params = [{transform_indices = @transform_0, window_bounds = array<i64: 2, 128>}, {pipeline_mode = #tpu.pipeline_mode<synchronous>, transform_indices = @transform_1, window_bounds = array<i64: 64, 128>}, {transform_indices = @transform_2, window_bounds = array<i64: 2, 128>}]} {
    %c0 = arith.constant 0 : index
    %c0_0 = arith.constant 0 : index
    %0 = vector.load %arg1[%c0, %c0_0] : memref<2x128xf32, #tpu.memory_space<vmem>>, vector<2x128xf32>
    %1 = arith.mulf %0, %0 : vector<2x128xf32>
    %2 = arith.mulf %1, %0 : vector<2x128xf32>
    %c0_1 = arith.constant 0 : index
    %c0_2 = arith.constant 0 : index
    %3 = vector.load %arg2[%c0_1, %c0_2] : memref<64x128xf32, #tpu.memory_space<vmem>>, vector<56x1xf32>
    %c0_3 = arith.constant 0 : index
    %c1 = arith.constant 1 : index
    %4 = vector.load %arg2[%c0_3, %c1] : memref<64x128xf32, #tpu.memory_space<vmem>>, vector<56x1xf32>
    %c0_4 = arith.constant 0 : index
    %c2 = arith.constant 2 : index
    %5 = vector.load %arg2[%c0_4, %c2] : memref<64x128xf32, #tpu.memory_space<vmem>>, vector<56x1xf32>
    %6 = vector.extract_strided_slice %2 {offsets = [0, 0], sizes = [1, 128], strides = [1, 1]} : vector<2x128xf32> to vector<1x128xf32>
    %7 = vector.broadcast %3 : vector<56x1xf32> to vector<56x128xf32>
    %8 = vector.broadcast %6 : vector<1x128xf32> to vector<56x128xf32>
    %9 = arith.mulf %7, %8 : vector<56x128xf32>
    %10 = vector.extract_strided_slice %2 {offsets = [1, 0], sizes = [1, 128], strides = [1, 1]} : vector<2x128xf32> to vector<1x128xf32>
    %11 = vector.broadcast %4 : vector<56x1xf32> to vector<56x128xf32>
    %12 = vector.broadcast %10 : vector<1x128xf32> to vector<56x128xf32>
    %13 = arith.mulf %11, %12 : vector<56x128xf32>
    %14 = arith.addf %9, %13 : vector<56x128xf32>
    %15 = vector.broadcast %5 : vector<56x1xf32> to vector<56x128xf32>
    %16 = arith.addf %14, %15 : vector<56x128xf32>
    %17 = math.tanh %16 : vector<56x128xf32>
    %c56 = arith.constant 56 : index
    %c0_5 = arith.constant 0 : index
    %18 = vector.load %arg2[%c56, %c0_5] : memref<64x128xf32, #tpu.memory_space<vmem>>, vector<2x56xf32>
    %c56_6 = arith.constant 56 : index
    %c56_7 = arith.constant 56 : index
    %19 = vector.load %arg2[%c56_6, %c56_7] : memref<64x128xf32, #tpu.memory_space<vmem>>, vector<2x1xf32>
    %cst = arith.constant dense<0.000000e+00> : vector<2x128xf32>
    %20 = tpu.matmul %18, %17, %cst {dimension_numbers = #tpu.dot_dimension_numbers<[1], [0], [0], [1], [0, 0, 1, 1], [], []>} : vector<2x56xf32>, vector<56x128xf32>, vector<2x128xf32> -> vector<2x128xf32>
    %21 = vector.broadcast %19 : vector<2x1xf32> to vector<2x128xf32>
    %22 = arith.addf %20, %21 : vector<2x128xf32>
    %c0_8 = arith.constant 0 : index
    %c0_9 = arith.constant 0 : index
    %23 = vector.load %arg3[%c0_8, %c0_9] : memref<2x128xf32, #tpu.memory_space<vmem>>, vector<2x128xf32>
    tpu.vector_store %arg3[%c0_8, %c0_9], %22 {strides = array<i32>} : memref<2x128xf32, #tpu.memory_space<vmem>>, vector<2x128xf32>,
    return
  }
  func.func @transform_0(%arg0: i32) -> (i32, i32) {
    %c0_i32 = arith.constant 0 : i32
    %c0_i32_0 = arith.constant 0 : i32
    return %c0_i32, %arg0 : i32, i32
  }
  func.func @transform_1(%arg0: i32) -> (i32, i32) {
    %c0_i32 = arith.constant 0 : i32
    %c0_i32_0 = arith.constant 0 : i32
    %c0_i32_1 = arith.constant 0 : i32
    return %c0_i32, %c0_i32_0 : i32, i32
  }
  func.func @transform_2(%arg0: i32) -> (i32, i32) {
    %c0_i32 = arith.constant 0 : i32
    %c0_i32_0 = arith.constant 0 : i32
    return %c0_i32, %arg0 : i32, i32
  }
}

</mosaic_0001>

<bundles_post_ra>
// kernel: odefunc_forward.1
= control target key start
LH: loop header
LB: loop body
LE: loop exit
PB: predicated region body
PF: predicated region fallthrough
CT: control target
= control target key end

     0   :  { %7 = vsyncpa [#allocation3], 0  ;;  %s342_s9 = smov [#allocation2]   ;;  %s387_s0 = inlined_call_operand.vmem [shape: f32[2,128], index: 0, kind: input, shape index: {}]   ;;  %s388_s1 = inlined_call_operand.hbm [shape: f32[64,128], index: 1, kind: input, shape index: {}]   ;;  %s389_s2 = inlined_call_operand.vmem [shape: f32[2,128], index: 2, kind: output, shape index: {}]  }
   0x1   :  { %s15_s10 = sshll.u32 %s342_s9, 4  ;;  %s16_s10 = int_to_ptr.vmem [resolvable:$true] %s15_s10 }
   0x2   :  { %s328_s11 = scalar_lea.vmem %s16_s10, 1024  ;;  %p333_p1 = scmp.lt.s32.totalorder %s16_s10, %s16_s10 }
   0x3   :  { %p329_p0 = scmp.ne.s32.totalorder %s16_s10, %s328_s11  ;;  %p334_p2 = scmp.lt.s32.totalorder %s328_s11, %s328_s11 }
   0x5   :  { %p335_p3 = por %p334_p2, %p333_p1 }
   0x7   :  { %p336_p4 = pnand %p335_p3, %p329_p0 }
   0x9   :  { %339 = shalt.err (!%p336_p4)
}
   0xa   :  { %s343_s12 = smov 128   ;;  %s344_s13 = smov 8  }
   0xb   :  { %21 = dma.hbm_to_vmem [thread:$0]  %s388_s1, 1024, %s16_s10, [#allocation3], %s343_s12, %s343_s12, %s344_s13  }
   0xc   :  { %340 = dma.done.wait [#allocation3], 1024  }
   0xd   :  { %341 = vsyncadd [#allocation3], 4294966272  ;;  %v345_v0 = vmov 0   ;;  %v34_v1 = vld [vmem:[#allocation2 + $0x30] sm:$0xff]  ;;  %v33_v2 = vld [vmem:[#allocation2 + $0x28] sm:$0xff]  ;;  %v346_v4 = vmov 1   ;;  %v70_v17 = vlaneseq }
   0xe   :  { %290 = vset.pattern.permute.xlu1 %v345_v0  ;;  %289 = vset.pattern.permute.xlu0 %v345_v0  ;;  %v31_v3 = vld [vmem:[#allocation2 + $0x18] sm:$0xff]  ;;  %v30_v5 = vld [vmem:[#allocation2 + $0x10] sm:$0xff]  ;;  %v32_v6 = vld [vmem:[#allocation2 + $0x20] sm:$0xff]  ;;  %v347_v7 = vmov 2   ;;  %v348_v10 = vmov 0.0   ;;  %vm349_vm0 = vmmov 0  }
   0xf   :  { %67 = vperm.xlu0 %289, %v34_v1   ;;  %62 = vperm.xlu1 %290, %v33_v2   ;;  %v28_v8 = vld [vmem:[#allocation2] sm:$0xff]  ;;  %v29_v9 = vld [vmem:[#allocation2 + $0x8] sm:$0xff]  ;;  %v371_v11 = vld [vmem:[#allocation2 + $0x38] sm:$0x3]  ;;  %v350_v12 = vmov 56   ;;  %v71_v21 = vshrl.u32 %v70_v17, 7 }
  0x10   :  { %263 = vmatprep.subr.mxu0 %v348_v10  ;;  %277 = vmatprep.mubr.msk.f32.mxu0 %vm349_vm0, %v348_v10  ;;  %v25_v18 = vld [vmem:[%s387_s0] sm:$0x3]  ;;  %vm175_vm1 = vcmask 457728  }
  0x11   :  { %v26_v22 = vmul.f32 %v25_v18, %v25_v18  ;;  %v111_v23 = vsub.s32 1, %v71_v21  ;;  %v72_v25 = vsub.s32 0, %v71_v21 }
  0x13   :  { %291 = vset.pattern.permute.xlu1 %v346_v4  ;;  %52 = vperm.xlu0 %289, %v31_v3   ;;  %v27_v26 = vmul.f32 %v26_v22, %v25_v18 }
  0x14   :  { %102 = vperm.xlu1 %291, %v33_v2  }
  0x15   :  { %v112_v28 = vrot.slane %v27_v26, %v111_v23  ;;  %v73_v30 = vrot.slane %v27_v26, %v72_v25 }
  0x17   :  { %47 = vperm.xlu0 %289, %v30_v5  }
  0x18   :  { %292 = vset.pattern.permute.xlu1 %v345_v0 }
  0x19   :  { %57 = vperm.xlu1 %292, %v32_v6  }
  0x1b   :  { %297 = vset.pattern.permute.xlu0 %v347_v7 }
  0x1c   :  { %144 = vperm.xlu0 %297, %v32_v6  }
  0x1d   :  { %293 = vset.pattern.permute.xlu1 %v347_v7 }
  0x1e   :  { %152 = vperm.xlu1 %293, %v34_v1  }
  0x20   :  { %140 = vperm.xlu0 %297, %v31_v3  }
  0x22   :  { %294 = vset.pattern.permute.xlu1 %v346_v4 }
  0x23   :  { %94 = vperm.xlu1 %294, %v31_v3  }
  0x24   :  { %300 = vset.pattern.permute.xlu0 %v346_v4 }
  0x25   :  { %106 = vperm.xlu0 %300, %v34_v1  }
  0x27   :  { %295 = vset.pattern.permute.xlu1 %v347_v7 }
  0x28   :  { %148 = vperm.xlu1 %295, %v33_v2  }
  0x29   :  { %98 = vperm.xlu0 %300, %v32_v6  }
  0x2c   :  { %296 = vset.pattern.permute.xlu1 %v346_v4 }
  0x2d   :  { %90 = vperm.xlu1 %296, %v30_v5   ;;  %82 = vperm.xlu0 %300, %v28_v8  }
  0x31   :  { %298 = vset.pattern.permute.xlu1 %v345_v0  ;;  %303 = vset.pattern.permute.xlu0 %v347_v7 }
  0x32   :  { %42 = vperm.xlu1 %298, %v29_v9   ;;  %128 = vperm.xlu0 %303, %v28_v8  }
  0x36   :  { %299 = vset.pattern.permute.xlu1 %v346_v4  ;;  %305 = vset.pattern.permute.xlu0 %v350_v12 }
  0x37   :  { %86 = vperm.xlu1 %299, %v29_v9  }
  0x3b   :  { %301 = vset.pattern.permute.xlu1 %v345_v0 }
  0x3c   :  { %37 = vperm.xlu1 %301, %v28_v8  }
  0x40   :  { %302 = vset.pattern.permute.xlu1 %v347_v7 }
  0x41   :  { %136 = vperm.xlu1 %302, %v30_v5  }
  0x45   :  { %132 = vperm.xlu1 %302, %v29_v9  }
  0x49   :  { %304 = vset.pattern.permute.xlu1 %v350_v12 }
  0x4a   :  { %172 = vperm.xlu1 %304, %v371_v11  }
  0x8a   :  { %v63_v13 = vpop.permute.xlu1 %62  ;;  %v68_v14 = vpop.permute.xlu0 %67 }
  0x8b   :  { %v79_v34 = vmul.f32 %v73_v30, %v63_v13  ;;  %v80_v35 = vmul.f32 %v73_v30, %v68_v14 }
  0x8e   :  { %v53_v15 = vpop.permute.xlu0 %52 }
  0x8f   :  { %v103_v16 = vpop.permute.xlu1 %102  ;;  %v77_v38 = vmul.f32 %v73_v30, %v53_v15 }
  0x90   :  { %v118_v32 = vmul.f32 %v112_v28, %v103_v16 }
  0x92   :  { %v48_v19 = vpop.permute.xlu0 %47  ;;  %v125_v41 = vadd.f32 %v118_v32, %v79_v34 }
  0x93   :  { %v76_v60 = vmul.f32 %v73_v30, %v48_v19 }
  0x94   :  { %v58_v20 = vpop.permute.xlu1 %57 }
  0x95   :  { %v78_v42 = vmul.f32 %v73_v30, %v58_v20 }
  0x97   :  { %v145_v24 = vpop.permute.xlu0 %144 }
  0x99   :  { %v153_v27 = vpop.permute.xlu1 %152 }
  0x9b   :  { %v141_v29 = vpop.permute.xlu0 %140 }
  0x9e   :  { %v95_v31 = vpop.permute.xlu1 %94 }
  0x9f   :  { %v116_v36 = vmul.f32 %v112_v28, %v95_v31 }
  0xa0   :  { %v107_v33 = vpop.permute.xlu0 %106 }
  0xa1   :  { %v119_v37 = vmul.f32 %v112_v28, %v107_v33  ;;  %v123_v44 = vadd.f32 %v116_v36, %v77_v38 }
  0xa3   :  { %v126_v39 = vadd.f32 %v119_v37, %v80_v35  ;;  %v149_v40 = vpop.permute.xlu1 %148  ;;  %v158_v50 = vadd.f32 %v141_v29, %v123_v44 }
  0xa4   :  { %v99_v43 = vpop.permute.xlu0 %98  ;;  %v160_v46 = vadd.f32 %v149_v40, %v125_v41 }
  0xa5   :  { %v161_v45 = vadd.f32 %v153_v27, %v126_v39  ;;  %v117_v47 = vmul.f32 %v112_v28, %v99_v43 }
  0xa7   :  { %306 = vtanh.f32 %v161_v45  ;;  %v124_v48 = vadd.f32 %v117_v47, %v78_v42 }
  0xa8   :  { %v91_v49 = vpop.permute.xlu1 %90  ;;  %308 = vtanh.f32 %v160_v46  ;;  %v83_v59 = vpop.permute.xlu0 %82 }
  0xa9   :  { %v159_v51 = vadd.f32 %v145_v24, %v124_v48  ;;  %v115_v56 = vmul.f32 %v112_v28, %v91_v49  ;;  %v113_v0 = vmul.f32 %v112_v28, %v83_v59 }
  0xab   :  { %310 = vtanh.f32 %v159_v51  ;;  %v122_v1 = vadd.f32 %v115_v56, %v76_v60 }
  0xac   :  { %312 = vtanh.f32 %v158_v50 }
  0xad   :  { %v43_v52 = vpop.permute.xlu1 %42  ;;  %v129_v6 = vpop.permute.xlu0 %128 }
  0xae   :  { %v75_v3 = vmul.f32 %v73_v30, %v43_v52 }
  0xb2   :  { %v87_v53 = vpop.permute.xlu1 %86 }
  0xb3   :  { %v114_v63 = vmul.f32 %v112_v28, %v87_v53 }
  0xb4   :  { %v307_v54 = vpop.eup %306 }
  0xb5   :  { %264 = vmatpush3.msra.mxu0 %v307_v54  ;;  %v309_v55 = vpop.eup %308  ;;  %v121_v7 = vadd.f32 %v114_v63, %v75_v3 }
  0xb6   :  { %265 = vmatprep.subr.mxu0 %v348_v10 }
  0xb7   :  { %v38_v57 = vpop.permute.xlu1 %37  ;;  %266 = vmatpush3.msra.mxu0 %v309_v55 }
  0xb8   :  { %v311_v58 = vpop.eup %310  ;;  %267 = vmatprep.subr.mxu0 %v348_v10  ;;  %v74_v61 = vmul.f32 %v73_v30, %v38_v57 }
  0xb9   :  { %268 = vmatpush3.msra.mxu0 %v311_v58  ;;  %v313_v62 = vpop.eup %312 }
  0xba   :  { %269 = vmatprep.subr.mxu0 %v348_v10  ;;  %v120_v4 = vadd.f32 %v113_v0, %v74_v61 }
  0xbb   :  { %270 = vmatpush3.msra.mxu0 %v313_v62 }
  0xbc   :  { %v137_v2 = vpop.permute.xlu1 %136  ;;  %271 = vmatprep.subr.mxu0 %v348_v10  ;;  %v155_v9 = vadd.f32 %v129_v6, %v120_v4 }
  0xbd   :  { %v157_v5 = vadd.f32 %v137_v2, %v122_v1 }
  0xbf   :  { %314 = vtanh.f32 %v157_v5 }
  0xc0   :  { %v133_v8 = vpop.permute.xlu1 %132 }
  0xc1   :  { %v156_v12 = vadd.f32 %v133_v8, %v121_v7 }
  0xc3   :  { %316 = vtanh.f32 %v156_v12 }
  0xc4   :  { %318 = vtanh.f32 %v155_v9 }
  0xc5   :  { %v173_v16 = vpop.permute.xlu1 %172 }
  0xcc   :  { %v315_v13 = vpop.eup %314 }
  0xcd   :  { %272 = vmatpush3.msra.mxu0 %v315_v13 }
  0xce   :  { %273 = vmatprep.subr.mxu0 %v348_v10 }
  0xd0   :  { %v317_v14 = vpop.eup %316 }
  0xd1   :  { %274 = vmatpush3.msra.mxu0 %v317_v14  ;;  %v319_v15 = vpop.eup %318 }
  0xd2   :  { %275 = vmatprep.subr.mxu0 %v348_v10 }
  0xd3   :  { %276 = vmatpush3.msra.mxu0 %v319_v15 }
  0xd4   :  { %278 = vmatmul.mubr.msk.f32.vlgmr.msra.gmra.mxu0 %vm175_vm1, %v371_v11 }
 0x194   :  { %v244_v17 = vpop.f32.mrf.mxu0 }
 0x195   :  { %v245_v18 = vadd.f32 %v244_v17, %v173_v16 }
 0x196   :  { %v279_v19 = vpop.f32.mrf.mxu0 }
 0x197   :  { %248 = vst [vmem:[%s389_s2] sm:$0x3] %v245_v18 }
 0x198   :  { %253 = vsyncpa [#allocation3], 1 }

</bundles_post_ra>
